<compile_context>
chip_gen: v7x
topology: tpu7x:2x2x1
jax: 0.10.0
libtpu: 0.0.40
codegen_flags: <defaults>
</compile_context>

<pallas_src>
import jax
import jax.numpy as jnp
from jax import lax
from jax.experimental import pallas as pl
from jax.experimental.pallas import tpu as pltpu


# ----------------------------- Pallas conv1d kernel -----------------------------

def _make_conv1d_kernel(*, K, stride, PL, Lp, W, L_out, C_in_g, co_tile,
                        use_patch, need_pad, patch_dtype, apply_act, neg_slope=0.2):
    """Kernel for one (batch, group, C_out-tile) block.

    x_ref  : (stride, C_in_g, Lp)  bf16, phase-folded, unpadded
    w_ref  : (co_tile, K*C_in_g)   [patch path]   or  (K, co_tile, C_in_g) [per-tap]
    b_ref  : (co_tile, 1) f32
    o_ref  : (co_tile, L_out)
    scratch: [pad_ref (stride, C_in_g, W) bf16] if need_pad,
             [patch_ref (K*C_in_g, L_out) patch_dtype] if use_patch
    """
    def kernel(x_ref, w_ref, b_ref, o_ref, *scratch):
        si = 0
        pad_ref = patch_ref = None
        if need_pad:
            pad_ref = scratch[si]; si += 1
        if use_patch:
            patch_ref = scratch[si]; si += 1

        if need_pad:
            # in-VMEM zero padding: zero the edges, copy the payload once per block
            if PL > 0:
                pad_ref[:, :, 0:PL] = jnp.zeros((stride, C_in_g, PL), jnp.bfloat16)
            if PL + Lp < W:
                pad_ref[:, :, PL + Lp:] = jnp.zeros((stride, C_in_g, W - PL - Lp),
                                                    jnp.bfloat16)
            pad_ref[:, :, PL:PL + Lp] = x_ref[...]
            src = pad_ref
        else:
            src = x_ref

        def tap(k):
            q, r = k // stride, k % stride
            return src[r, :, q:q + L_out]          # (C_in_g, L_out), contiguous lanes

        if use_patch:
            # fold all K taps into one deep MXU contraction (im2col patch in VMEM)
            for k in range(K):
                patch_ref[k * C_in_g:(k + 1) * C_in_g, :] = tap(k).astype(patch_dtype)
            lhs = w_ref[...]
            if lhs.dtype != patch_dtype:
                lhs = lhs.astype(patch_dtype)
            acc = jnp.dot(lhs, patch_ref[...], preferred_element_type=jnp.float32)
            acc = acc + b_ref[...]
        else:
            # wide C_in: contraction already deep -> per-tap dots, bias-seeded acc
            acc = pl.broadcast_to(b_ref[...], (co_tile, L_out)).astype(jnp.float32)
            for k in range(K):
                acc = acc + jnp.dot(w_ref[k], tap(k),
                                    preferred_element_type=jnp.float32)

        if apply_act:
            acc = jnp.where(acc > 0, acc, neg_slope * acc)   # LeakyReLU(0.2)
        o_ref[...] = acc.astype(o_ref.dtype)

    return kernel


def conv1d_pallas(x, w, b, *, stride, pad, groups, apply_act, out_dtype=jnp.bfloat16):
    """Grouped 1D conv (PyTorch Conv1d semantics, zero padding) + optional LeakyReLU.

    x: (B, C_in, L)   w: (C_out, C_in//groups, K)   b: (C_out,)
    """
    B, C_in, L = x.shape
    C_out, C_in_g, K = w.shape
    assert C_in % groups == 0 and C_out % groups == 0
    assert C_in_g == C_in // groups
    assert pad % stride == 0, "padding must be a multiple of stride (holds here)"
    C_out_g = C_out // groups

    s = stride
    PL = pad // s                      # per-phase left zero pad
    L_out = (L + 2 * pad - K) // s + 1
    assert L_out >= 1
    Lp = -(-L // s)                    # ceil(L / s): per-phase payload length
    q_max = (K - 1) // s
    W = max(L_out + q_max, PL + Lp)    # per-phase padded width inside VMEM

    co_tile = C_out_g if C_out_g <= 256 else 256
    assert C_out_g % co_tile == 0
    n_co = C_out_g // co_tile

    # --- HBM-side prep: bf16 + phase fold (stride folded into a leading axis) ---
    xb = x.astype(jnp.bfloat16)
    if Lp * s != L:
        xb = jnp.pad(xb, ((0, 0), (0, 0), (0, Lp * s - L)))
    # (B, C_in, Lp*s) -> (B, G, C_in_g, Lp, s) -> (B, G, s, C_in_g, Lp)
    x5 = xb.reshape(B, groups, C_in_g, Lp, s).transpose(0, 1, 4, 2, 3)

    wb = w.astype(jnp.bfloat16).reshape(groups, C_out_g, C_in_g, K)
    use_patch = C_in_g < 128           # shallow contraction -> fold K via im2col
    if use_patch:
        w_in = wb.transpose(0, 1, 3, 2).reshape(groups, C_out_g, K * C_in_g)
        w_spec = pl.BlockSpec((None, co_tile, K * C_in_g),
                              lambda g, co, b_: (g, co, 0))
    else:
        w_in = wb.transpose(0, 3, 1, 2)              # (G, K, C_out_g, C_in_g)
        w_spec = pl.BlockSpec((None, K, co_tile, C_in_g),
                              lambda g, co, b_: (g, 0, co, 0))
    b_in = b.astype(jnp.float32).reshape(groups, C_out_g, 1)

    need_pad = (PL > 0) or (W > Lp)
    # bf16 patch rows must land on packed sublane pairs; fall back to f32 otherwise
    patch_dtype = jnp.bfloat16 if (C_in_g % 2 == 0) else jnp.float32
    scratch = []
    if need_pad:
        scratch.append(pltpu.VMEM((s, C_in_g, W), jnp.bfloat16))
    if use_patch:
        scratch.append(pltpu.VMEM((K * C_in_g, L_out), patch_dtype))

    kernel = _make_conv1d_kernel(K=K, stride=s, PL=PL, Lp=Lp, W=W, L_out=L_out,
                                 C_in_g=C_in_g, co_tile=co_tile,
                                 use_patch=use_patch, need_pad=need_pad,
                                 patch_dtype=patch_dtype, apply_act=apply_act)

    out5 = pl.pallas_call(
        kernel,
        out_shape=jax.ShapeDtypeStruct((B, groups, C_out_g, L_out), out_dtype),
        # batch innermost: the weight/bias block indices are unchanged across it,
        # so Pallas skips their re-DMA (effectively a single live weight copy).
        grid=(groups, n_co, B),
        in_specs=[
            pl.BlockSpec((None, None, s, C_in_g, Lp),
                         lambda g, co, b_: (b_, g, 0, 0, 0)),
            w_spec,
            pl.BlockSpec((None, co_tile, 1), lambda g, co, b_: (g, co, 0)),
        ],
        out_specs=pl.BlockSpec((None, None, co_tile, L_out),
                               lambda g, co, b_: (b_, g, co, 0)),
        scratch_shapes=scratch,
        compiler_params=pltpu.CompilerParams(
            dimension_semantics=("parallel", "parallel", "parallel"),
            vmem_limit_bytes=32 * 1024 * 1024,
        ),
    )(x5, w_in, b_in)

    return out5.reshape(B, C_out, L_out)


# ----------------------------- module construction ------------------------------

def build_configs(ndf, n_layers, downsampling_factor):
    """Mirror NLayerDiscriminator.__init__ layer-by-layer."""
    cfgs = [dict(c_in=1, c_out=ndf, k=15, stride=1, pad=7, groups=1,
                 pad_mode="reflect", act=True)]                       # layer_0
    nf = ndf
    stride = downsampling_factor
    nf_prev = nf
    for _ in range(1, n_layers + 1):                                  # layer_1..n_layers
        nf_prev = nf
        nf = min(nf * stride, 1024)
        cfgs.append(dict(c_in=nf_prev, c_out=nf, k=stride * 10 + 1, stride=stride,
                         pad=stride * 5, groups=nf_prev // 4, pad_mode="zero", act=True))
    nf = min(nf * 2, 1024)
    # NOTE: as in the reference module, this layer reads `nf_prev` channels; it is
    # shape-consistent when downsampling_factor==1 or when widths clamp at 1024.
    cfgs.append(dict(c_in=nf_prev, c_out=nf, k=5, stride=1, pad=2, groups=1,
                     pad_mode="zero", act=True))                      # layer_{n_layers+1}
    cfgs.append(dict(c_in=nf, c_out=1, k=3, stride=1, pad=1, groups=1,
                     pad_mode="zero", act=False))                     # layer_{n_layers+2}
    return cfgs


def init_params(cfgs, key):
    """Deterministic weight-norm init: w = g * v / ||v|| (norm over dims 1,2)."""
    params = []
    for i, c in enumerate(cfgs):
        kv, kg, kb = jax.random.split(jax.random.fold_in(key, i), 3)
        v = jax.random.normal(kv, (c["c_out"], c["c_in"] // c["groups"], c["k"]),
                              jnp.float32) * 0.2
        g = jnp.abs(jax.random.normal(kg, (c["c_out"],), jnp.float32)) * 0.5 + 0.5
        norm = jnp.sqrt(jnp.sum(v * v, axis=(1, 2)) + 1e-12)
        w = v * (g / norm)[:, None, None]
        b = jax.random.normal(kb, (c["c_out"],), jnp.float32) * 0.1
        params.append((w, b))
    return params


def forward(x, cfgs, params):
    """Pallas forward; returns every layer's output (like the PyTorch module).
    Intermediate activations are bf16; the final layer output is f32."""
    results = []
    n = len(cfgs)
    for i, (c, (w, b)) in enumerate(zip(cfgs, params)):
        if c["pad_mode"] == "reflect":
            # tiny reflect pad (layer_0, C_in=1) stays in the wrapper
            x_in = jnp.pad(x, ((0, 0), (0, 0), (c["pad"], c["pad"])), mode="reflect")
            pad = 0
        else:
            x_in, pad = x, c["pad"]          # zero pad happens inside the kernel
        out_dtype = jnp.float32 if i == n - 1 else jnp.bfloat16
        x = conv1d_pallas(x_in, w, b, stride=c["stride"], pad=pad,
                          groups=c["groups"], apply_act=c["act"], out_dtype=out_dtype)
        results.append(x)
    return results


# ----------------------------- pure-JAX reference --------------------------------

def conv1d_ref(x, w, b, *, stride, pad, groups, apply_act, out_dtype, pad_mode="zero"):
    """lax.conv reference with the same bf16-in / f32-accumulate numerics."""
    xb = x.astype(jnp.bfloat16)
    wb = w.astype(jnp.bfloat16)
    mode = "reflect" if pad_mode == "reflect" else "constant"
    xp = jnp.pad(xb, ((0, 0), (0, 0), (pad, pad)), mode=mode)
    y = lax.conv_general_dilated(xp, wb, (stride,), "VALID",
                                 dimension_numbers=("NCH", "OIH", "NCH"),
                                 feature_group_count=groups,
                                 preferred_element_type=jnp.float32)
    y = y + b.astype(jnp.float32)[None, :, None]
    if apply_act:
        y = jnp.where(y > 0, y, 0.2 * y)
    return y.astype(out_dtype)


if __name__ == "__main__":
    # Small config: ndf=8, n_layers=2, downsampling_factor=1
    # (df=1 keeps the reference module's channel flow consistent end-to-end).
    ndf, n_layers, downsampling_factor = 8, 2, 1
    B, L = 2, 64

    key = jax.random.PRNGKey(0)
    cfgs = build_configs(ndf, n_layers, downsampling_factor)
    params = init_params(cfgs, jax.random.fold_in(key, 123))
    x = jax.random.normal(jax.random.fold_in(key, 7), (B, 1, L), jnp.float32)

    outs = forward(x, cfgs, params)
    outs = jax.block_until_ready(outs)

    def assert_close(name, o, r):
        of, rf = o.astype(jnp.float32), r.astype(jnp.float32)
        assert of.shape == rf.shape, (name, of.shape, rf.shape)
        err = float(jnp.max(jnp.abs(of - rf)))
        tol = 1e-2 + 1e-2 * float(jnp.max(jnp.abs(rf)))
        assert err <= tol, (name, err, tol)

    # layer-by-layer check against a lax.conv reference fed the same bf16 inputs
    # the Pallas chain saw (only accumulation-order / one-ulp rounding noise remains)
    cur = x
    n = len(cfgs)
    for i, (c, (w, b), o) in enumerate(zip(cfgs, params, outs)):
        out_dtype = jnp.float32 if i == n - 1 else jnp.bfloat16
        r = conv1d_ref(cur, w, b, stride=c["stride"], pad=c["pad"], groups=c["groups"],
                       apply_act=c["act"], out_dtype=out_dtype, pad_mode=c["pad_mode"])
        assert_close(f"layer_{i}", o, r)
        cur = o

    # standalone check: strided grouped conv (exercises phase folding + im2col path).
    # Not part of the chained demo because the reference module's channel flow only
    # composes end-to-end for downsampling_factor == 1.
    kA = jax.random.fold_in(key, 1000)
    wA = jax.random.normal(jax.random.fold_in(kA, 0), (32, 4, 41), jnp.float32) / (4 * 41) ** 0.5
    bA = jax.random.normal(jax.random.fold_in(kA, 1), (32,), jnp.float32) * 0.1
    xA = jax.random.normal(jax.random.fold_in(kA, 2), (2, 8, 64), jnp.float32)
    oA = jax.block_until_ready(conv1d_pallas(xA, wA, bA, stride=4, pad=20, groups=2,
                                             apply_act=True, out_dtype=jnp.float32))
    rA = conv1d_ref(xA, wA, bA, stride=4, pad=20, groups=2, apply_act=True,
                    out_dtype=jnp.float32)
    assert_close("strided_grouped", oA, rA)

    # standalone check: wide per-group C_in (exercises the per-tap MXU path).
    kB = jax.random.fold_in(key, 2000)
    wB = jax.random.normal(jax.random.fold_in(kB, 0), (8, 128, 3), jnp.float32) / (128 * 3) ** 0.5
    bB = jax.random.normal(jax.random.fold_in(kB, 1), (8,), jnp.float32) * 0.1
    xB = jax.random.normal(jax.random.fold_in(kB, 2), (1, 256, 32), jnp.float32)
    oB = jax.block_until_ready(conv1d_pallas(xB, wB, bB, stride=1, pad=1, groups=2,
                                             apply_act=False, out_dtype=jnp.float32))
    rB = conv1d_ref(xB, wB, bB, stride=1, pad=1, groups=2, apply_act=False,
                    out_dtype=jnp.float32)
    assert_close("wide_cin_group", oB, rB)

    print("KERNEL_OK")
</pallas_src>

<mosaic_0001>
module attributes {stable_mosaic.version = 11 : i64} {
  func.func @kernel(%arg0: i32, %arg1: i32, %arg2: i32, %arg3: memref<1x1x1x1x78xbf16, #tpu.memory_space<vmem>>, %arg4: memref<1x8x15xbf16, #tpu.memory_space<vmem>>, %arg5: memref<1x8x1xf32, #tpu.memory_space<vmem>>, %arg6: memref<1x1x8x64xbf16, #tpu.memory_space<vmem>>, %arg7: memref<15x64xf32, #tpu.memory_space<vmem>>) attributes {dimension_semantics = [#tpu.dimension_semantics<parallel>, #tpu.dimension_semantics<parallel>, #tpu.dimension_semantics<parallel>], iteration_bounds = array<i64: 1, 1, 2>, scalar_prefetch = 0 : i64, scratch_operands = 1 : i64, tpu.core_type = #tpu.core_type<tc>, window_params = [{transform_indices = @transform_0, window_bounds = array<i64: 1, 1, 1, 1, 78>}, {transform_indices = @transform_1, window_bounds = array<i64: 1, 8, 15>}, {transform_indices = @transform_2, window_bounds = array<i64: 1, 8, 1>}, {transform_indices = @transform_3, window_bounds = array<i64: 1, 1, 8, 64>}]} {
    %c0 = arith.constant 0 : index
    %c0_0 = arith.constant 0 : index
    %c0_1 = arith.constant 0 : index
    %c0_2 = arith.constant 0 : index
    %c0_3 = arith.constant 0 : index
    %0 = vector.load %arg3[%c0, %c0_0, %c0_1, %c0_2, %c0_3] : memref<1x1x1x1x78xbf16, #tpu.memory_space<vmem>>, vector<1x1x1x1x64xbf16>
    %1 = vector.shape_cast %0 : vector<1x1x1x1x64xbf16> to vector<1x64xbf16>
    %2 = arith.extf %1 : vector<1x64xbf16> to vector<1x64xf32>
    %c0_4 = arith.constant 0 : index
    %c0_5 = arith.constant 0 : index
    %3 = vector.load %arg7[%c0_4, %c0_5] : memref<15x64xf32, #tpu.memory_space<vmem>>, vector<1x64xf32>
    tpu.vector_store %arg7[%c0_4, %c0_5], %2 {strides = array<i32>} : memref<15x64xf32, #tpu.memory_space<vmem>>, vector<1x64xf32>,
    %c0_6 = arith.constant 0 : index
    %c0_7 = arith.constant 0 : index
    %c0_8 = arith.constant 0 : index
    %c0_9 = arith.constant 0 : index
    %c1 = arith.constant 1 : index
    %4 = vector.load %arg3[%c0_6, %c0_7, %c0_8, %c0_9, %c1] : memref<1x1x1x1x78xbf16, #tpu.memory_space<vmem>>, vector<1x1x1x1x64xbf16>
    %5 = vector.shape_cast %4 : vector<1x1x1x1x64xbf16> to vector<1x64xbf16>
    %6 = arith.extf %5 : vector<1x64xbf16> to vector<1x64xf32>
    %c1_10 = arith.constant 1 : index
    %c0_11 = arith.constant 0 : index
    %7 = vector.load %arg7[%c1_10, %c0_11] : memref<15x64xf32, #tpu.memory_space<vmem>>, vector<1x64xf32>
    tpu.vector_store %arg7[%c1_10, %c0_11], %6 {strides = array<i32>} : memref<15x64xf32, #tpu.memory_space<vmem>>, vector<1x64xf32>,
    %c0_12 = arith.constant 0 : index
    %c0_13 = arith.constant 0 : index
    %c0_14 = arith.constant 0 : index
    %c0_15 = arith.constant 0 : index
    %c2 = arith.constant 2 : index
    %8 = vector.load %arg3[%c0_12, %c0_13, %c0_14, %c0_15, %c2] : memref<1x1x1x1x78xbf16, #tpu.memory_space<vmem>>, vector<1x1x1x1x64xbf16>
    %9 = vector.shape_cast %8 : vector<1x1x1x1x64xbf16> to vector<1x64xbf16>
    %10 = arith.extf %9 : vector<1x64xbf16> to vector<1x64xf32>
    %c2_16 = arith.constant 2 : index
    %c0_17 = arith.constant 0 : index
    %11 = vector.load %arg7[%c2_16, %c0_17] : memref<15x64xf32, #tpu.memory_space<vmem>>, vector<1x64xf32>
    tpu.vector_store %arg7[%c2_16, %c0_17], %10 {strides = array<i32>} : memref<15x64xf32, #tpu.memory_space<vmem>>, vector<1x64xf32>,
    %c0_18 = arith.constant 0 : index
    %c0_19 = arith.constant 0 : index
    %c0_20 = arith.constant 0 : index
    %c0_21 = arith.constant 0 : index
    %c3 = arith.constant 3 : index
    %12 = vector.load %arg3[%c0_18, %c0_19, %c0_20, %c0_21, %c3] : memref<1x1x1x1x78xbf16, #tpu.memory_space<vmem>>, vector<1x1x1x1x64xbf16>
    %13 = vector.shape_cast %12 : vector<1x1x1x1x64xbf16> to vector<1x64xbf16>
    %14 = arith.extf %13 : vector<1x64xbf16> to vector<1x64xf32>
    %c3_22 = arith.constant 3 : index
    %c0_23 = arith.constant 0 : index
    %15 = vector.load %arg7[%c3_22, %c0_23] : memref<15x64xf32, #tpu.memory_space<vmem>>, vector<1x64xf32>
    tpu.vector_store %arg7[%c3_22, %c0_23], %14 {strides = array<i32>} : memref<15x64xf32, #tpu.memory_space<vmem>>, vector<1x64xf32>,
    %c0_24 = arith.constant 0 : index
    %c0_25 = arith.constant 0 : index
    %c0_26 = arith.constant 0 : index
    %c0_27 = arith.constant 0 : index
    %c4 = arith.constant 4 : index
    %16 = vector.load %arg3[%c0_24, %c0_25, %c0_26, %c0_27, %c4] : memref<1x1x1x1x78xbf16, #tpu.memory_space<vmem>>, vector<1x1x1x1x64xbf16>
    %17 = vector.shape_cast %16 : vector<1x1x1x1x64xbf16> to vector<1x64xbf16>
    %18 = arith.extf %17 : vector<1x64xbf16> to vector<1x64xf32>
    %c4_28 = arith.constant 4 : index
    %c0_29 = arith.constant 0 : index
    %19 = vector.load %arg7[%c4_28, %c0_29] : memref<15x64xf32, #tpu.memory_space<vmem>>, vector<1x64xf32>
    tpu.vector_store %arg7[%c4_28, %c0_29], %18 {strides = array<i32>} : memref<15x64xf32, #tpu.memory_space<vmem>>, vector<1x64xf32>,
    %c0_30 = arith.constant 0 : index
    %c0_31 = arith.constant 0 : index
    %c0_32 = arith.constant 0 : index
    %c0_33 = arith.constant 0 : index
    %c5 = arith.constant 5 : index
    %20 = vector.load %arg3[%c0_30, %c0_31, %c0_32, %c0_33, %c5] : memref<1x1x1x1x78xbf16, #tpu.memory_space<vmem>>, vector<1x1x1x1x64xbf16>
    %21 = vector.shape_cast %20 : vector<1x1x1x1x64xbf16> to vector<1x64xbf16>
    %22 = arith.extf %21 : vector<1x64xbf16> to vector<1x64xf32>
    %c5_34 = arith.constant 5 : index
    %c0_35 = arith.constant 0 : index
    %23 = vector.load %arg7[%c5_34, %c0_35] : memref<15x64xf32, #tpu.memory_space<vmem>>, vector<1x64xf32>
    tpu.vector_store %arg7[%c5_34, %c0_35], %22 {strides = array<i32>} : memref<15x64xf32, #tpu.memory_space<vmem>>, vector<1x64xf32>,
    %c0_36 = arith.constant 0 : index
    %c0_37 = arith.constant 0 : index
    %c0_38 = arith.constant 0 : index
    %c0_39 = arith.constant 0 : index
    %c6 = arith.constant 6 : index
    %24 = vector.load %arg3[%c0_36, %c0_37, %c0_38, %c0_39, %c6] : memref<1x1x1x1x78xbf16, #tpu.memory_space<vmem>>, vector<1x1x1x1x64xbf16>
    %25 = vector.shape_cast %24 : vector<1x1x1x1x64xbf16> to vector<1x64xbf16>
    %26 = arith.extf %25 : vector<1x64xbf16> to vector<1x64xf32>
    %c6_40 = arith.constant 6 : index
    %c0_41 = arith.constant 0 : index
    %27 = vector.load %arg7[%c6_40, %c0_41] : memref<15x64xf32, #tpu.memory_space<vmem>>, vector<1x64xf32>
    tpu.vector_store %arg7[%c6_40, %c0_41], %26 {strides = array<i32>} : memref<15x64xf32, #tpu.memory_space<vmem>>, vector<1x64xf32>,
    %c0_42 = arith.constant 0 : index
    %c0_43 = arith.constant 0 : index
    %c0_44 = arith.constant 0 : index
    %c0_45 = arith.constant 0 : index
    %c7 = arith.constant 7 : index
    %28 = vector.load %arg3[%c0_42, %c0_43, %c0_44, %c0_45, %c7] : memref<1x1x1x1x78xbf16, #tpu.memory_space<vmem>>, vector<1x1x1x1x64xbf16>
    %29 = vector.shape_cast %28 : vector<1x1x1x1x64xbf16> to vector<1x64xbf16>
    %30 = arith.extf %29 : vector<1x64xbf16> to vector<1x64xf32>
    %c7_46 = arith.constant 7 : index
    %c0_47 = arith.constant 0 : index
    %31 = vector.load %arg7[%c7_46, %c0_47] : memref<15x64xf32, #tpu.memory_space<vmem>>, vector<1x64xf32>
    tpu.vector_store %arg7[%c7_46, %c0_47], %30 {strides = array<i32>} : memref<15x64xf32, #tpu.memory_space<vmem>>, vector<1x64xf32>,
    %c0_48 = arith.constant 0 : index
    %c0_49 = arith.constant 0 : index
    %c0_50 = arith.constant 0 : index
    %c0_51 = arith.constant 0 : index
    %c8 = arith.constant 8 : index
    %32 = vector.load %arg3[%c0_48, %c0_49, %c0_50, %c0_51, %c8] : memref<1x1x1x1x78xbf16, #tpu.memory_space<vmem>>, vector<1x1x1x1x64xbf16>
    %33 = vector.shape_cast %32 : vector<1x1x1x1x64xbf16> to vector<1x64xbf16>
    %34 = arith.extf %33 : vector<1x64xbf16> to vector<1x64xf32>
    %c8_52 = arith.constant 8 : index
    %c0_53 = arith.constant 0 : index
    %35 = vector.load %arg7[%c8_52, %c0_53] : memref<15x64xf32, #tpu.memory_space<vmem>>, vector<1x64xf32>
    tpu.vector_store %arg7[%c8_52, %c0_53], %34 {strides = array<i32>} : memref<15x64xf32, #tpu.memory_space<vmem>>, vector<1x64xf32>,
    %c0_54 = arith.constant 0 : index
    %c0_55 = arith.constant 0 : index
    %c0_56 = arith.constant 0 : index
    %c0_57 = arith.constant 0 : index
    %c9 = arith.constant 9 : index
    %36 = vector.load %arg3[%c0_54, %c0_55, %c0_56, %c0_57, %c9] : memref<1x1x1x1x78xbf16, #tpu.memory_space<vmem>>, vector<1x1x1x1x64xbf16>
    %37 = vector.shape_cast %36 : vector<1x1x1x1x64xbf16> to vector<1x64xbf16>
    %38 = arith.extf %37 : vector<1x64xbf16> to vector<1x64xf32>
    %c9_58 = arith.constant 9 : index
    %c0_59 = arith.constant 0 : index
    %39 = vector.load %arg7[%c9_58, %c0_59] : memref<15x64xf32, #tpu.memory_space<vmem>>, vector<1x64xf32>
    tpu.vector_store %arg7[%c9_58, %c0_59], %38 {strides = array<i32>} : memref<15x64xf32, #tpu.memory_space<vmem>>, vector<1x64xf32>,
    %c0_60 = arith.constant 0 : index
    %c0_61 = arith.constant 0 : index
    %c0_62 = arith.constant 0 : index
    %c0_63 = arith.constant 0 : index
    %c10 = arith.constant 10 : index
    %40 = vector.load %arg3[%c0_60, %c0_61, %c0_62, %c0_63, %c10] : memref<1x1x1x1x78xbf16, #tpu.memory_space<vmem>>, vector<1x1x1x1x64xbf16>
    %41 = vector.shape_cast %40 : vector<1x1x1x1x64xbf16> to vector<1x64xbf16>
    %42 = arith.extf %41 : vector<1x64xbf16> to vector<1x64xf32>
    %c10_64 = arith.constant 10 : index
    %c0_65 = arith.constant 0 : index
    %43 = vector.load %arg7[%c10_64, %c0_65] : memref<15x64xf32, #tpu.memory_space<vmem>>, vector<1x64xf32>
    tpu.vector_store %arg7[%c10_64, %c0_65], %42 {strides = array<i32>} : memref<15x64xf32, #tpu.memory_space<vmem>>, vector<1x64xf32>,
    %c0_66 = arith.constant 0 : index
    %c0_67 = arith.constant 0 : index
    %c0_68 = arith.constant 0 : index
    %c0_69 = arith.constant 0 : index
    %c11 = arith.constant 11 : index
    %44 = vector.load %arg3[%c0_66, %c0_67, %c0_68, %c0_69, %c11] : memref<1x1x1x1x78xbf16, #tpu.memory_space<vmem>>, vector<1x1x1x1x64xbf16>
    %45 = vector.shape_cast %44 : vector<1x1x1x1x64xbf16> to vector<1x64xbf16>
    %46 = arith.extf %45 : vector<1x64xbf16> to vector<1x64xf32>
    %c11_70 = arith.constant 11 : index
    %c0_71 = arith.constant 0 : index
    %47 = vector.load %arg7[%c11_70, %c0_71] : memref<15x64xf32, #tpu.memory_space<vmem>>, vector<1x64xf32>
    tpu.vector_store %arg7[%c11_70, %c0_71], %46 {strides = array<i32>} : memref<15x64xf32, #tpu.memory_space<vmem>>, vector<1x64xf32>,
    %c0_72 = arith.constant 0 : index
    %c0_73 = arith.constant 0 : index
    %c0_74 = arith.constant 0 : index
    %c0_75 = arith.constant 0 : index
    %c12 = arith.constant 12 : index
    %48 = vector.load %arg3[%c0_72, %c0_73, %c0_74, %c0_75, %c12] : memref<1x1x1x1x78xbf16, #tpu.memory_space<vmem>>, vector<1x1x1x1x64xbf16>
    %49 = vector.shape_cast %48 : vector<1x1x1x1x64xbf16> to vector<1x64xbf16>
    %50 = arith.extf %49 : vector<1x64xbf16> to vector<1x64xf32>
    %c12_76 = arith.constant 12 : index
    %c0_77 = arith.constant 0 : index
    %51 = vector.load %arg7[%c12_76, %c0_77] : memref<15x64xf32, #tpu.memory_space<vmem>>, vector<1x64xf32>
    tpu.vector_store %arg7[%c12_76, %c0_77], %50 {strides = array<i32>} : memref<15x64xf32, #tpu.memory_space<vmem>>, vector<1x64xf32>,
    %c0_78 = arith.constant 0 : index
    %c0_79 = arith.constant 0 : index
    %c0_80 = arith.constant 0 : index
    %c0_81 = arith.constant 0 : index
    %c13 = arith.constant 13 : index
    %52 = vector.load %arg3[%c0_78, %c0_79, %c0_80, %c0_81, %c13] : memref<1x1x1x1x78xbf16, #tpu.memory_space<vmem>>, vector<1x1x1x1x64xbf16>
    %53 = vector.shape_cast %52 : vector<1x1x1x1x64xbf16> to vector<1x64xbf16>
    %54 = arith.extf %53 : vector<1x64xbf16> to vector<1x64xf32>
    %c13_82 = arith.constant 13 : index
    %c0_83 = arith.constant 0 : index
    %55 = vector.load %arg7[%c13_82, %c0_83] : memref<15x64xf32, #tpu.memory_space<vmem>>, vector<1x64xf32>
    tpu.vector_store %arg7[%c13_82, %c0_83], %54 {strides = array<i32>} : memref<15x64xf32, #tpu.memory_space<vmem>>, vector<1x64xf32>,
    %c0_84 = arith.constant 0 : index
    %c0_85 = arith.constant 0 : index
    %c0_86 = arith.constant 0 : index
    %c0_87 = arith.constant 0 : index
    %c14 = arith.constant 14 : index
    %56 = vector.load %arg3[%c0_84, %c0_85, %c0_86, %c0_87, %c14] : memref<1x1x1x1x78xbf16, #tpu.memory_space<vmem>>, vector<1x1x1x1x64xbf16>
    %57 = vector.shape_cast %56 : vector<1x1x1x1x64xbf16> to vector<1x64xbf16>
    %58 = arith.extf %57 : vector<1x64xbf16> to vector<1x64xf32>
    %c14_88 = arith.constant 14 : index
    %c0_89 = arith.constant 0 : index
    %59 = vector.load %arg7[%c14_88, %c0_89] : memref<15x64xf32, #tpu.memory_space<vmem>>, vector<1x64xf32>
    tpu.vector_store %arg7[%c14_88, %c0_89], %58 {strides = array<i32>} : memref<15x64xf32, #tpu.memory_space<vmem>>, vector<1x64xf32>,
    %c0_90 = arith.constant 0 : index
    %c0_91 = arith.constant 0 : index
    %c0_92 = arith.constant 0 : index
    %60 = vector.load %arg4[%c0_90, %c0_91, %c0_92] : memref<1x8x15xbf16, #tpu.memory_space<vmem>>, vector<1x8x15xbf16>
    %61 = vector.shape_cast %60 : vector<1x8x15xbf16> to vector<8x15xbf16>
    %62 = arith.extf %61 : vector<8x15xbf16> to vector<8x15xf32>
    %c0_93 = arith.constant 0 : index
    %c0_94 = arith.constant 0 : index
    %63 = vector.load %arg7[%c0_93, %c0_94] : memref<15x64xf32, #tpu.memory_space<vmem>>, vector<15x64xf32>
    %cst = arith.constant dense<0.000000e+00> : vector<8x64xf32>
    %64 = tpu.matmul %62, %63, %cst {dimension_numbers = #tpu.dot_dimension_numbers<[1], [0], [0], [1], [0, 0, 1, 1], [], []>} : vector<8x15xf32>, vector<15x64xf32>, vector<8x64xf32> -> vector<8x64xf32>
    %c0_95 = arith.constant 0 : index
    %c0_96 = arith.constant 0 : index
    %c0_97 = arith.constant 0 : index
    %65 = vector.load %arg5[%c0_95, %c0_96, %c0_97] : memref<1x8x1xf32, #tpu.memory_space<vmem>>, vector<1x8x1xf32>
    %66 = vector.shape_cast %65 : vector<1x8x1xf32> to vector<8x1xf32>
    %67 = vector.broadcast %66 : vector<8x1xf32> to vector<8x64xf32>
    %68 = arith.addf %64, %67 : vector<8x64xf32>
    %cst_98 = arith.constant 0.000000e+00 : f32
    %69 = vector.broadcast %cst_98 : f32 to vector<8x64xf32>
    %70 = arith.cmpf ogt, %68, %69 : vector<8x64xf32>
    %cst_99 = arith.constant 2.000000e-01 : f32
    %71 = vector.broadcast %cst_99 : f32 to vector<8x64xf32>
    %72 = arith.mulf %71, %68 : vector<8x64xf32>
    %73 = arith.select %70, %68, %72 : vector<8x64xi1>, vector<8x64xf32>
    %74 = arith.truncf %73 : vector<8x64xf32> to vector<8x64xbf16>
    %c0_100 = arith.constant 0 : index
    %c0_101 = arith.constant 0 : index
    %c0_102 = arith.constant 0 : index
    %c0_103 = arith.constant 0 : index
    %75 = vector.load %arg6[%c0_100, %c0_101, %c0_102, %c0_103] : memref<1x1x8x64xbf16, #tpu.memory_space<vmem>>, vector<1x1x8x64xbf16>
    %76 = vector.shape_cast %75 : vector<1x1x8x64xbf16> to vector<8x64xbf16>
    %77 = vector.shape_cast %74 : vector<8x64xbf16> to vector<1x1x8x64xbf16>
    tpu.vector_store %arg6[%c0_100, %c0_101, %c0_102, %c0_103], %77 {strides = array<i32>} : memref<1x1x8x64xbf16, #tpu.memory_space<vmem>>, vector<1x1x8x64xbf16>,
    return
  }
  func.func @transform_0(%arg0: i32, %arg1: i32, %arg2: i32) -> (i32, i32, i32, i32, i32) {
    %c0_i32 = arith.constant 0 : i32
    %c0_i32_0 = arith.constant 0 : i32
    %c0_i32_1 = arith.constant 0 : i32
    %c0_i32_2 = arith.constant 0 : i32
    return %arg2, %arg0, %c0_i32, %c0_i32_0, %c0_i32_1 : i32, i32, i32, i32, i32
  }
  func.func @transform_1(%arg0: i32, %arg1: i32, %arg2: i32) -> (i32, i32, i32) {
    %c0_i32 = arith.constant 0 : i32
    %c0_i32_0 = arith.constant 0 : i32
    return %arg0, %arg1, %c0_i32 : i32, i32, i32
  }
  func.func @transform_2(%arg0: i32, %arg1: i32, %arg2: i32) -> (i32, i32, i32) {
    %c0_i32 = arith.constant 0 : i32
    %c0_i32_0 = arith.constant 0 : i32
    return %arg0, %arg1, %c0_i32 : i32, i32, i32
  }
  func.func @transform_3(%arg0: i32, %arg1: i32, %arg2: i32) -> (i32, i32, i32, i32) {
    %c0_i32 = arith.constant 0 : i32
    %c0_i32_0 = arith.constant 0 : i32
    return %arg2, %arg0, %arg1, %c0_i32 : i32, i32, i32, i32
  }
}

</mosaic_0001>

<bundles_post_ra>
// kernel: tpu_custom_call.1
= control target key start
LH: loop header
LB: loop body
LE: loop exit
PB: predicated region body
PF: predicated region fallthrough
CT: control target
= control target key end

     0   :  { %8 = vsyncpa [#allocation4], 0  ;;  %s1018_s0 = inlined_call_operand.vmem [shape: bf16[2,1,1,1,78], index: 0, kind: input, shape index: {}]   ;;  %s1019_s1 = inlined_call_operand.vmem [shape: bf16[1,8,15], index: 1, kind: input, shape index: {}]   ;;  %s1020_s2 = inlined_call_operand.vmem [shape: f32[1,8,1], index: 2, kind: input, shape index: {}]   ;;  %s1021_s3 = inlined_call_operand.hbm [shape: bf16[2,1,8,64], index: 3, kind: output, shape index: {}]  }
   0x1   :  { %10 = vsyncpa [#allocation4 + $0x1], 0  ;;  %s852_s12 = smov 0   ;;  %s854_s13 = smov 0  }
   0x2   :  { %s856_s14 = smov 0   ;;  %s858_s15 = smov 0  }
   0x3   :  { %s860_s16 = smov 0   ;;  %s862_s17 = smov 0  }
   0x4 LB: > { %s629_s18 = sadd.s32 4294967295, %s810_s17   ;;  %s630_s19 = sadd.s32 4294967294, %s810_s17   ;;  %s810_s17 = sphi %s862_s17, %s16_s17   ;;  %s806_s16 = sphi %s860_s16, %s1028_s16   ;;  %s802_s15 = sphi %s858_s15, %s1027_s15   ;;  %s798_s14 = sphi %s856_s14, %s1026_s14   ;;  %s794_s13 = sphi %s854_s13, %s1025_s13   ;;  %s790_s12 = sphi %s852_s12, %s1024_s12  }
   0x5   : > { %s28_s20 = sadd.s32 1, %s806_s16  ;;  %s130_s21 = sadd.s32 1, %s798_s14 }
   0x6   : > { %p29_p0 = scmp.ge.s32.totalorder %s28_s20, 2  ;;  %p140_p1 = scmp.ne.s32.totalorder %s798_s14, %s794_s13 }
   0x7   : > { %p141_p2 = scmp.eq.s32.totalorder %s629_s18, 1  ;;  %p146_p3 = scmp.ne.s32.totalorder %s794_s13, %s790_s12 }
   0x8   : > { %s1030_s20 = smov (%p29_p0, %s28_s20), 0  ;;  %p147_p5 = scmp.eq.s32.totalorder %s630_s19, 1 }
   0x9   : > { %p892_p4 = por %p141_p2, %p140_p1  ;;  %s123_s23 = ssub.s32 %s806_s16, %s1030_s20 }
   0xa   : > { %p635_p6 = scmp.ge.s32.totalorder %s810_s17, 1  ;;  %p128_p7 = scmp.eq.s32.totalorder %s123_s23, 0 }
   0xb   : > { %p899_p8 = por %p147_p5, %p146_p3  ;;  %p194_p9 = scmp.lt.s32.totalorder %s810_s17, 3 }
   0xc   : > { %s905_s25 = scalar_select %p128_p7, %s798_s14, %s130_s21  }
   0xd   : > { %p195_p10 = pnand %p635_p6, %p194_p9 }
   0xe   : > { %p233_p11 = scmp.lt.s32.totalorder (!%p195_p10), %s802_s15, 1  ;;  %v260_v0 = vlaneseq (!%p195_p10)  ;;  %s812_s30 = smov (!%p195_p10), 125   ;;  %vm255_vm0 = vcmask (!%p195_p10), 516096   ;;  %v820_v41 = vmov (!%p195_p10), 0.0|0.0   ;;  %vm825_vm1 = vmmov (!%p195_p10), 0   ;;  %v415_v50 = vld [vmem:[%s1020_s2] sm:$0xff] (!%p195_p10) }
   0xf   : > { %198 = sbr.rel (%p195_p10) target bundleno = 416 (0x1a0), region = 32  ;;  %s813_s4 = smov (!%p195_p10), 127   ;;  %653 = vmatprep.subr.bf16.mxu0 (!%p195_p10), %v820_v41  ;;  %v826_v48 = vmov (!%p195_p10), 0.0   ;;  %v829_v49 = vmov (!%p195_p10), 0   ;;  %vm425_vm2 = vcmask (!%p195_p10), 1046528   ;;  %vm830_vm3 = vmmov (!%p195_p10), 1  }
  0x10   : > { %v261_v1 = vshrl.u32 (!%p195_p10), %v260_v0, 7  ;;  %s814_s5 = smov (!%p195_p10), 124   ;;  %s815_s6 = smov (!%p195_p10), 126   ;;  %650 = vmatprep.mubr.msk.f32.mxu0 (!%p195_p10), %vm825_vm1, %v826_v48  ;;  %731 = vset.pattern.permute.xlu0 (!%p195_p10), %v829_v49  ;;  %vm655_vm4 = vmpackc.low (!%p195_p10), %vm425_vm2, %vm830_vm3  ;;  %vm421_vm5 = vcmask (!%p195_p10), 121856   ;;  %vm503_vm7 = vcmask (!%p195_p10), 519168  }
  0x11   : > { %s816_s7 = smov (!%p195_p10), 122   ;;  %s817_s8 = smov (!%p195_p10), 123  }
  0x12   : > { %v914_v2 = vsub.s32 (!%p195_p10), 0, %v261_v1  ;;  %s818_s9 = smov (!%p195_p10), 120   ;;  %s819_s10 = smov (!%p195_p10), 121   ;;  %v411_v1 = vld [vmem:[%s1019_s1] sm:$0xf] (!%p195_p10) }
  0x13   : > { %s821_s11 = smov (!%p195_p10), 118   ;;  %s822_s18 = smov (!%p195_p10), 119  }
  0x14   : > { %s823_s19 = smov (!%p195_p10), 116   ;;  %s824_s21 = smov (!%p195_p10), 117  }
  0x15   : > { %s827_s23 = smov (!%p195_p10), 114  }
  0x16   : > { %s234_s26 = scalar_select %p233_p11, %s802_s15, 1 }
  0x18   : > { %s912_s29 = scalar_lea.vmem %s1018_s0, %s234_s26  ;;  %s828_s26 = smov 115  }
  0x19   : > { %v279_v3 = vld [vmem:[%s912_s29] sm:$0x1] }
  0x1a   : > { %v257_v4 = vld [vmem:[%s912_s29] sm:$0x1]  ;;  %v280_v6 = vunpack.c.l.bf16 %v279_v3 }
  0x1b   : > { %v290_v5 = vld [vmem:[%s912_s29] sm:$0x1]  ;;  %v258_v7 = vunpack.c.l.bf16 %v257_v4 }
  0x1c   : > { %v291_v8 = vunpack.c.l.bf16 %v290_v5  ;;  %v268_v9 = vld [vmem:[%s912_s29] sm:$0x1]  ;;  %v285_v13 = vrot.slane %v280_v6, %v914_v2  ;;  %v412_v5 = vunpack.c.l.bf16 %v411_v1 }
  0x1d   : > { %v269_v10 = vunpack.c.l.bf16 %v268_v9  ;;  %v312_v11 = vld [vmem:[%s912_s29] sm:$0x1]  ;;  %v263_v14 = vrot.slane %v258_v7, %v914_v2 }
  0x1e   : > { %v301_v12 = vld [vmem:[%s912_s29] sm:$0x1]  ;;  %286 = vrot.lane.b32.xlu1 %v285_v13, %s812_s30  ;;  %v296_v15 = vrot.slane %v291_v8, %v914_v2  ;;  %v313_v17 = vunpack.c.l.bf16 %v312_v11 }
  0x1f   : > { %264 = vrot.lane.b32.xlu0 %v263_v14, %s813_s4  ;;  %v274_v16 = vrot.slane %v269_v10, %v914_v2  ;;  %v302_v18 = vunpack.c.l.bf16 %v301_v12  ;;  %v334_v19 = vld [vmem:[%s912_s29] sm:$0x1]  ;;  %s230_s4 = sand.u32 1, %s794_s13  }
  0x20   : > { %v323_v20 = vld [vmem:[%s912_s29] sm:$0x1]  ;;  %v318_v23 = vrot.slane %v313_v17, %v914_v2  ;;  %v335_v25 = vunpack.c.l.bf16 %v334_v19 }
  0x21   : > { %v253_v21 = vld [vmem:[%s912_s29] sm:$0x1]  ;;  %v307_v24 = vrot.slane %v302_v18, %v914_v2  ;;  %v324_v26 = vunpack.c.l.bf16 %v323_v20 }
  0x22   : > { %v254_v22 = vunpack.c.l.bf16 %v253_v21  ;;  %297 = vrot.lane.b32.xlu1 %v296_v15, %s814_s5  ;;  %v356_v27 = vld [vmem:[%s912_s29] sm:$0x1]  ;;  %v340_v29 = vrot.slane %v335_v25, %v914_v2  ;;  %s636_s5 = sshll.u32 %s230_s4, 2 }
  0x23   : > { %275 = vrot.lane.b32.xlu0 %v274_v16, %s815_s6  ;;  %v345_v28 = vld [vmem:[%s912_s29] sm:$0x1]  ;;  %v329_v30 = vrot.slane %v324_v26, %v914_v2  ;;  %v357_v31 = vunpack.c.l.bf16 %v356_v27  ;;  %s640_s6 = sshll.u32 %s802_s15, 6  ;;  %s831_s15 = smov [#allocation3]  }
  0x24   : > { %256 = vst.msk [vmem:[#allocation2] sm:$0x1] %vm255_vm0, %v254_v22  ;;  %v346_v32 = vunpack.c.l.bf16 %v345_v28  ;;  %v378_v33 = vld [vmem:[%s912_s29] sm:$0x1] }
  0x25   : > { %v367_v34 = vld [vmem:[%s912_s29] sm:$0x1]  ;;  %v362_v35 = vrot.slane %v357_v31, %v914_v2  ;;  %v379_v37 = vunpack.c.l.bf16 %v378_v33 }
  0x26   : > { %319 = vrot.lane.b32.xlu1 %v318_v23, %s816_s7  ;;  %v351_v36 = vrot.slane %v346_v32, %v914_v2  ;;  %v368_v38 = vunpack.c.l.bf16 %v367_v34  ;;  %v400_v39 = vld [vmem:[%s912_s29] sm:$0x1]  ;;  %s232_s7 = scalar_lea.vmem [#allocation3], %s636_s5 }
  0x27   : > { %308 = vrot.lane.b32.xlu0 %v307_v24, %s817_s8  ;;  %v389_v40 = vld [vmem:[%s912_s29] sm:$0x1]  ;;  %v384_v42 = vrot.slane %v379_v37, %v914_v2  ;;  %v401_v44 = vunpack.c.l.bf16 %v400_v39  ;;  %s521_s8 = sshll.u32 %s232_s7, 4  ;;  %s973_s8 = int_to_ptr.vmem [resolvable:$true] %s521_s8 }
  0x28   : > { %v373_v43 = vrot.slane %v368_v38, %v914_v2  ;;  %v390_v45 = vunpack.c.l.bf16 %v389_v40 }
  0x29   : > { %v406_v46 = vrot.slane %v401_v44, %v914_v2 }
  0x2a   : > { %341 = vrot.lane.b32.xlu1 %v340_v29, %s818_s9  ;;  %v395_v47 = vrot.slane %v390_v45, %v914_v2 }
  0x2b   : > { %330 = vrot.lane.b32.xlu0 %v329_v30, %s819_s10 }
  0x2e   : > { %363 = vrot.lane.b32.xlu1 %v362_v35, %s821_s11  ;;  %s971_s11 = scalar_lea.hbm %s1021_s3, %s640_s6 }
  0x2f   : > { %352 = vrot.lane.b32.xlu0 %v351_v36, %s822_s18  ;;  %s506_s18 = scalar_lea.sflag [#allocation4], %s230_s4 }
  0x32   : > { %385 = vrot.lane.b32.xlu1 %v384_v42, %s823_s19  ;;  %s732_s19 = scalar_lea.vmem %s973_s8, 64 }
  0x33   : > { %374 = vrot.lane.b32.xlu0 %v373_v43, %s824_s21  ;;  %p733_p12 = scmp.ne.s32.totalorder %s973_s8, %s732_s19  ;;  %s736_s21 = sshll.u32 %s831_s15, 4  ;;  %s737_s21 = int_to_ptr.vmem [resolvable:$false] %s736_s21 }
  0x34   : > { %p739_p1 = scmp.lt.s32.totalorder %s973_s8, %s737_s21 }
  0x35   : > { %p734_p13 = pnand %p733_p12, %p892_p4 }
  0x36   : > { %407 = vrot.lane.b32.xlu1 %v406_v46, %s827_s23  ;;  %s738_s23 = scalar_lea.vmem %s737_s21, 128 }
  0x37   : > { %396 = vrot.lane.b32.xlu0 %v395_v47, %s828_s26  ;;  %p735_p0 = pneg %p734_p13  ;;  %p740_p2 = scmp.lt.s32.totalorder %s738_s23, %s732_s19 }
  0x39   : > { %p741_p3 = por %p740_p2, %p739_p1 }
  0x3b   : > { %418 = vperm.xlu0 %731, %v415_v50   ;;  %p742_p5 = pnand %p741_p3, %p735_p0 }
  0x90   : > { %v287_v51 = vpop.permute.xlu1 %286 }
  0x91   : > { %v265_v52 = vpop.permute.xlu0 %264  ;;  %289 = vst.msk [vmem:[#allocation2 + $0x3] sm:$0x1] %vm255_vm0, %v287_v51 }
  0x92   : > { %267 = vst.msk [vmem:[#allocation2 + $0x1] sm:$0x1] %vm255_vm0, %v265_v52 }
  0x94   : > { %v298_v53 = vpop.permute.xlu1 %297 }
  0x95   : > { %v276_v54 = vpop.permute.xlu0 %275  ;;  %300 = vst.msk [vmem:[#allocation2 + $0x4] sm:$0x1] %vm255_vm0, %v298_v53 }
  0x96   : > { %278 = vst.msk [vmem:[#allocation2 + $0x2] sm:$0x1] %vm255_vm0, %v276_v54 }
  0x98   : > { %v320_v55 = vpop.permute.xlu1 %319 }
  0x99   : > { %v309_v56 = vpop.permute.xlu0 %308  ;;  %322 = vst.msk [vmem:[#allocation2 + $0x6] sm:$0x1] %vm255_vm0, %v320_v55 }
  0x9a   : > { %311 = vst.msk [vmem:[#allocation2 + $0x5] sm:$0x1] %vm255_vm0, %v309_v56 }
  0x9c   : > { %v342_v57 = vpop.permute.xlu1 %341 }
  0x9d   : > { %v331_v58 = vpop.permute.xlu0 %330  ;;  %344 = vst.msk [vmem:[#allocation2 + $0x8] sm:$0x1] %vm255_vm0, %v342_v57 }
  0x9e   : > { %333 = vst.msk [vmem:[#allocation2 + $0x7] sm:$0x1] %vm255_vm0, %v331_v58 }
  0xa0   : > { %v364_v59 = vpop.permute.xlu1 %363 }
  0xa1   : > { %v353_v60 = vpop.permute.xlu0 %352  ;;  %366 = vst.msk [vmem:[#allocation2 + $0xa] sm:$0x1] %vm255_vm0, %v364_v59 }
  0xa2   : > { %355 = vst.msk [vmem:[#allocation2 + $0x9] sm:$0x1] %vm255_vm0, %v353_v60 }
  0xa4   : > { %v386_v61 = vpop.permute.xlu1 %385 }
  0xa5   : > { %v375_v62 = vpop.permute.xlu0 %374  ;;  %388 = vst.msk [vmem:[#allocation2 + $0xc] sm:$0x1] %vm255_vm0, %v386_v61  ;;  %v413_v2 = vld [vmem:[#allocation2] sm:$0xff] }
  0xa6   : > { %377 = vst.msk [vmem:[#allocation2 + $0xb] sm:$0x1] %vm255_vm0, %v375_v62 }
  0xa8   : > { %v408_v63 = vpop.permute.xlu1 %407 }
  0xa9   : > { %v397_v0 = vpop.permute.xlu0 %396  ;;  %410 = vst.msk [vmem:[#allocation2 + $0xe] sm:$0x1] %vm255_vm0, %v408_v63 }
  0xaa   : > { %399 = vst.msk [vmem:[#allocation2 + $0xd] sm:$0x1] %vm255_vm0, %v397_v0 }
  0xb1   : > { %v414_v3 = vld [vmem:[#allocation2 + $0x8] sm:$0x7f] }
  0xb2   : > { %v654_v4 = vpack.c.bf16 %v414_v3, %v413_v2 }
  0xb4   : > { %656 = vmatpush3.bf16.msk.msra.mxu0 %vm655_vm4, %v654_v4 }
  0xb7   : > { %651 = vmatmul.mubr.msk.f32.vlgmr.msra.gmra.mrb[0].mxu0 %vm421_vm5, %v412_v5 }
  0xba   : > { %v419_v6 = vpop.permute.xlu0 %418 }
 0x18a   : > { %v495_v7 = vpop.f32.mrb[0].mxu0 }
 0x18b   : > { %v496_v8 = vadd.f32 %v495_v7, %v419_v6  ;;  %v652_v9 = vpop.f32.mrb[1].mxu0 }
 0x18d   : > { %vm499_vm6 = vcmp.gt.f32.partialorder %v496_v8, 0.0  ;;  %v500_v10 = vmul.f32 0.2, %v496_v8 }
 0x18f   : > { %v501_v11 = vsel %vm499_vm6, %v496_v8, %v500_v10 }
 0x190   : > { %v502_v12 = vpack.c.bf16 %v501_v11, %v501_v11 }
 0x192   : > { %504 = vst.msk [vmem:[%s232_s7] sm:$0xf] %vm503_vm7, %v502_v12 }
 0x193   : > { %745 = shalt.err (!%p742_p5)
}
 0x194   : > { %s746_s26 = scalar_lea.hbm %s971_s11, 64  ;;  %s750_s29 = scalar_lea.hbm %s1021_s3, 128 }
 0x195   : > { %p747_p6 = scmp.ne.s32.totalorder %s971_s11, %s746_s26  ;;  %p751_p10 = scmp.lt.u32.totalorder %s971_s11, %s1021_s3 }
 0x196   : > { %p752_p11 = scmp.lt.u32.totalorder %s750_s29, %s746_s26  ;;  %p754_p13 = scmp.lt.u32.totalorder %s746_s26, %s971_s11 }
 0x197   : > { %p748_p7 = pnand %p747_p6, %p892_p4 }
 0x198   : > { %p753_p12 = por %p752_p11, %p751_p10 }
 0x199   : > { %p749_p9 = pneg %p748_p7 }
 0x19a   : > { %p755_p0 = por %p754_p13, %p753_p12 }
 0x19c   : > { %p756_p1 = pnand %p755_p0, %p749_p9 }
 0x19e   : > { %759 = shalt.err (!%p756_p1)
}
 0x19f   : > { %657 = dma.vmem_to_hbm [thread:$0]  (%p892_p4), %s973_s8, 64, %s971_s11, %s506_s18  }
 0x1a0 PF: > { %p663_p2 = scmp.ge.s32.totalorder %s810_s17, 2  ;;  %s533_s5 = sand.u32 1, %s790_s12  }
 0x1a1   : > { %s534_s6 = scalar_lea.sflag [#allocation4], %s533_s5 }
 0x1a2   : > { %p660_p3 = pnand %p663_p2, %p899_p8 }
 0x1a4   : > { %785 = dma.done.wait (!%p660_p3), %s534_s6, 64  }
 0x1a5   : > { %787 = vsyncadd (!%p660_p3), %s534_s6, 4294967232  ;;  %s16_s17 = sadd.s32 1, %s810_s17   ;;  %s1024_s12 = smov %s794_s13 }
 0x1a6   : > { %p13_p5 = scmp.ge.s32.totalorder %s16_s17, 4   ;;  %s1025_s13 = smov %s798_s14 }
 0x1a7   : > { %s1026_s14 = smov %s905_s25  ;;  %s1027_s15 = smov %s806_s16 }
 0x1a8   : > { %s1028_s16 = smov %s1030_s20  ;;  %15 = sbr.rel (!%p13_p5) target bundleno = 4 (0x4), region = 73 }
 0x1af   :  { %539 = vsyncpa [#allocation4], 1 }
 0x1b0   :  { %541 = vsyncpa [#allocation4 + $0x1], 1 }

</bundles_post_ra>
